<compile_context>
chip_gen: v7x
topology: tpu7x:2x2x1
jax: 0.10.0
libtpu: 0.0.40
codegen_flags: <defaults>
</compile_context>

<pallas_src>
import jax
import jax.numpy as jnp
from jax.experimental import pallas as pl
from jax.experimental.pallas import tpu as pltpu


def _logreg_kernel(x_ref, wt_ref, b_ref, out_ref, theta_ref):
    x = x_ref[...]          # [TM, in_dim]
    wt = wt_ref[...]        # [in_dim, n_class]  (pre-transposed at init)
    b = b_ref[...]          # [1, n_class]

    # logits = x @ W.T + b -- W already stored transposed, so this is a plain
    # MXU matmul with f32 accumulation; bias-add and softmax stay in f32.
    logits = jnp.dot(x, wt, preferred_element_type=jnp.float32)
    logits = logits + b.astype(jnp.float32)
    theta_ref[...] = logits.astype(theta_ref.dtype)

    # Numerically stable softmax along dim=1.  Exact divide (not the approx
    # EUP reciprocal): the kernel is HBM-store-bound, so the exact VPU divide
    # is free and keeps row sums at 1 to f32 precision.
    m = jnp.max(logits, axis=1, keepdims=True)
    e = jnp.exp(logits - m)
    denom = jnp.sum(e, axis=1, keepdims=True)
    out_ref[...] = (e / denom).astype(out_ref.dtype)


def prepare_logreg_params(w, b, dtype=None):
    """One-time parameter prep (do this at init, NOT per forward call).

    w: [n_class, in_dim] (nn.Linear weight layout), b: [n_class]
    Returns (wt, b2) with wt: [in_dim, n_class], b2: [1, n_class].
    """
    dt = dtype if dtype is not None else w.dtype
    wt = jnp.transpose(jnp.asarray(w, dt))          # [in_dim, n_class]
    b2 = jnp.asarray(b, jnp.float32).reshape(1, -1)  # bias kept f32 for the add
    return wt, b2


def logistic_regression_forward(x, wt, b2, *, block_b=512):
    """x: [B, in_dim], wt: [in_dim, n_class], b2: [1, n_class]
    Returns (softmax(x @ W.T + b), x @ W.T + b) -- matches the PyTorch module.
    """
    B, in_dim = x.shape
    n_class = wt.shape[1]

    # Batch tile: full B when small (block dim == full array dim satisfies the
    # (8,128) rule), otherwise 512-row tiles (multiple of 8) double-buffered
    # over the grid.  Per-step VMEM ~ 2*tm*in_dim + 2*2*tm*n_class words plus
    # the resident W^T/bias -- a few MiB at tm=512 for typical in_dim.
    tm = B if B <= block_b else block_b
    grid = (pl.cdiv(B, tm),)
    # Note: if B % tm != 0 the final step computes exp/softmax on out-of-range
    # padding rows; the results are discarded by the output BlockSpec, so any
    # inf/NaN in those discarded rows is benign.

    out, theta = pl.pallas_call(
        _logreg_kernel,
        out_shape=(
            jax.ShapeDtypeStruct((B, n_class), x.dtype),  # softmax(out), unpadded
            jax.ShapeDtypeStruct((B, n_class), x.dtype),  # Theta_x,      unpadded
        ),
        grid=grid,
        in_specs=[
            pl.BlockSpec((tm, in_dim), lambda i: (i, 0)),      # x: blocked over B
            pl.BlockSpec((in_dim, n_class), lambda i: (0, 0)),  # W^T: resident
            pl.BlockSpec((1, n_class), lambda i: (0, 0)),       # bias: resident
        ],
        out_specs=(
            pl.BlockSpec((tm, n_class), lambda i: (i, 0)),
            pl.BlockSpec((tm, n_class), lambda i: (i, 0)),
        ),
        compiler_params=pltpu.CompilerParams(
            dimension_semantics=("parallel",)),
    )(x, wt, b2)

    return out, theta


if __name__ == "__main__":
    # Small shapes consistent with the module: batch=8, in_dim=32, n_class=8
    B, IN_DIM, N_CLASS = 8, 32, 8

    key = jax.random.PRNGKey(0)
    kx, kw, kb = jax.random.split(key, 3)

    x = jax.random.normal(kx, (B, IN_DIM), dtype=jnp.float32)
    # Deterministic parameter init (mimics nn.Linear uniform(-1/sqrt(in_dim), ...))
    bound = 1.0 / jnp.sqrt(jnp.float32(IN_DIM))
    w = jax.random.uniform(kw, (N_CLASS, IN_DIM), dtype=jnp.float32,
                           minval=-bound, maxval=bound)
    b = jax.random.uniform(kb, (N_CLASS,), dtype=jnp.float32,
                           minval=-bound, maxval=bound)

    # One-time parameter preparation (hoisted out of the forward pass).
    wt, b2 = prepare_logreg_params(w, b)

    out, theta_x = logistic_regression_forward(x, wt, b2)
    jax.block_until_ready((out, theta_x))

    # Sanity check against plain-JAX reference.
    logits_ref = x @ w.T + b
    out_ref = jax.nn.softmax(logits_ref, axis=1)
    assert jnp.allclose(theta_x, logits_ref, atol=1e-5, rtol=1e-5)
    assert jnp.allclose(out, out_ref, atol=1e-5, rtol=1e-5)
    assert jnp.allclose(jnp.sum(out, axis=1), 1.0, atol=1e-5)

    print("KERNEL_OK")
</pallas_src>

<mosaic_0001>
module attributes {stable_mosaic.version = 11 : i64} {
  func.func @_logreg_kernel(%arg0: i32, %arg1: memref<8x32xf32, #tpu.memory_space<vmem>>, %arg2: memref<32x8xf32, #tpu.memory_space<vmem>>, %arg3: memref<1x8xf32, #tpu.memory_space<vmem>>, %arg4: memref<8x8xf32, #tpu.memory_space<vmem>>, %arg5: memref<8x8xf32, #tpu.memory_space<vmem>>) attributes {dimension_semantics = [#tpu.dimension_semantics<parallel>], iteration_bounds = array<i64: 1>, scalar_prefetch = 0 : i64, scratch_operands = 0 : i64, tpu.core_type = #tpu.core_type<tc>, window_params = [{transform_indices = @transform_0, window_bounds = array<i64: 8, 32>}, {pipeline_mode = #tpu.pipeline_mode<synchronous>, transform_indices = @transform_1, window_bounds = array<i64: 32, 8>}, {pipeline_mode = #tpu.pipeline_mode<synchronous>, transform_indices = @transform_2, window_bounds = array<i64: 1, 8>}, {transform_indices = @transform_3, window_bounds = array<i64: 8, 8>}, {transform_indices = @transform_4, window_bounds = array<i64: 8, 8>}]} {
    %c0 = arith.constant 0 : index
    %c0_0 = arith.constant 0 : index
    %0 = vector.load %arg1[%c0, %c0_0] : memref<8x32xf32, #tpu.memory_space<vmem>>, vector<8x32xf32>
    %c0_1 = arith.constant 0 : index
    %c0_2 = arith.constant 0 : index
    %1 = vector.load %arg2[%c0_1, %c0_2] : memref<32x8xf32, #tpu.memory_space<vmem>>, vector<32x8xf32>
    %c0_3 = arith.constant 0 : index
    %c0_4 = arith.constant 0 : index
    %2 = vector.load %arg3[%c0_3, %c0_4] : memref<1x8xf32, #tpu.memory_space<vmem>>, vector<1x8xf32>
    %cst = arith.constant dense<0.000000e+00> : vector<8x8xf32>
    %3 = tpu.matmul %0, %1, %cst {dimension_numbers = #tpu.dot_dimension_numbers<[1], [0], [0], [1], [0, 0, 1, 1], [], []>} : vector<8x32xf32>, vector<32x8xf32>, vector<8x8xf32> -> vector<8x8xf32>
    %4 = vector.broadcast %2 : vector<1x8xf32> to vector<8x8xf32>
    %5 = arith.addf %3, %4 : vector<8x8xf32>
    %c0_5 = arith.constant 0 : index
    %c0_6 = arith.constant 0 : index
    %6 = vector.load %arg5[%c0_5, %c0_6] : memref<8x8xf32, #tpu.memory_space<vmem>>, vector<8x8xf32>
    tpu.vector_store %arg5[%c0_5, %c0_6], %5 {strides = array<i32>} : memref<8x8xf32, #tpu.memory_space<vmem>>, vector<8x8xf32>,
    %cst_7 = arith.constant dense<0xFF800000> : vector<8xf32>
    %7 = vector.multi_reduction <maximumf>, %5, %cst_7 [1] : vector<8x8xf32> to vector<8xf32>
    %8 = vector.shape_cast %7 : vector<8xf32> to vector<8x1xf32>
    %9 = vector.broadcast %8 : vector<8x1xf32> to vector<8x8xf32>
    %10 = arith.subf %5, %9 : vector<8x8xf32>
    %11 = math.exp %10 : vector<8x8xf32>
    %cst_8 = arith.constant dense<0.000000e+00> : vector<8xf32>
    %12 = vector.multi_reduction <add>, %11, %cst_8 [1] : vector<8x8xf32> to vector<8xf32>
    %13 = vector.shape_cast %12 : vector<8xf32> to vector<8x1xf32>
    %14 = vector.broadcast %13 : vector<8x1xf32> to vector<8x8xf32>
    %15 = arith.divf %11, %14 : vector<8x8xf32>
    %c0_9 = arith.constant 0 : index
    %c0_10 = arith.constant 0 : index
    %16 = vector.load %arg4[%c0_9, %c0_10] : memref<8x8xf32, #tpu.memory_space<vmem>>, vector<8x8xf32>
    tpu.vector_store %arg4[%c0_9, %c0_10], %15 {strides = array<i32>} : memref<8x8xf32, #tpu.memory_space<vmem>>, vector<8x8xf32>,
    return
  }
  func.func @transform_0(%arg0: i32) -> (i32, i32) {
    %c0_i32 = arith.constant 0 : i32
    %c0_i32_0 = arith.constant 0 : i32
    return %arg0, %c0_i32 : i32, i32
  }
  func.func @transform_1(%arg0: i32) -> (i32, i32) {
    %c0_i32 = arith.constant 0 : i32
    %c0_i32_0 = arith.constant 0 : i32
    %c0_i32_1 = arith.constant 0 : i32
    return %c0_i32, %c0_i32_0 : i32, i32
  }
  func.func @transform_2(%arg0: i32) -> (i32, i32) {
    %c0_i32 = arith.constant 0 : i32
    %c0_i32_0 = arith.constant 0 : i32
    %c0_i32_1 = arith.constant 0 : i32
    return %c0_i32, %c0_i32_0 : i32, i32
  }
  func.func @transform_3(%arg0: i32) -> (i32, i32) {
    %c0_i32 = arith.constant 0 : i32
    %c0_i32_0 = arith.constant 0 : i32
    return %arg0, %c0_i32 : i32, i32
  }
  func.func @transform_4(%arg0: i32) -> (i32, i32) {
    %c0_i32 = arith.constant 0 : i32
    %c0_i32_0 = arith.constant 0 : i32
    return %arg0, %c0_i32 : i32, i32
  }
}

</mosaic_0001>

<bundles_post_ra>
// kernel: tpu_custom_call.1
= control target key start
LH: loop header
LB: loop body
LE: loop exit
PB: predicated region body
PF: predicated region fallthrough
CT: control target
= control target key end

     0   :  { %10 = vsyncpa [#allocation3], 0  ;;  %v227_v3 = vmov 0.0|0.0   ;;  %vm228_vm0 = vmmov 0   ;;  %v229_v6 = vmov 0.0   ;;  %s303_s0 = inlined_call_operand.vmem [shape: f32[8,32], index: 0, kind: input, shape index: {}]   ;;  %s304_s1 = inlined_call_operand.vmem [shape: f32[32,8], index: 1, kind: input, shape index: {}]   ;;  %s305_s2 = inlined_call_operand.vmem [shape: f32[1,8], index: 2, kind: input, shape index: {}]   ;;  %s306_s3 = inlined_call_operand.hbm [shape: f32[8,8], index: 3, kind: output, shape index: {0}]   ;;  %s307_s4 = inlined_call_operand.hbm [shape: f32[8,8], index: 4, kind: output, shape index: {1}]  }
   0x1   :  { %v19_v0 = vld [vmem:[%s304_s1] sm:$0xff]  ;;  %v20_v1 = vld [vmem:[%s304_s1 + $0x8] sm:$0xff]  ;;  %v21_v2 = vld [vmem:[%s304_s1 + $0x10] sm:$0xff]  ;;  %164 = vmatprep.subr.bf16.mxu0 %v227_v3  ;;  %161 = vmatprep.mubr.msk.f32.mxu0 %vm228_vm0, %v229_v6 }
   0x2   :  { %v165_v4 = vpack.c.bf16 %v20_v1, %v19_v0  ;;  %v22_v5 = vld [vmem:[%s304_s1 + $0x18] sm:$0xff] }
   0x3   :  { %11 = vsyncpa [#allocation5], 0  ;;  %v168_v7 = vpack.c.bf16 %v22_v5, %v21_v2  ;;  %v18_v8 = vld [vmem:[%s303_s0] sm:$0xff]  ;;  %vm30_vm1 = vcmask 261120   ;;  %vm104_vm2 = vcmask 64512   ;;  %s230_s0 = smov [#allocation4]  }
   0x4   :  { %166 = vmatpush3.bf16.msra.mxu0 %v165_v4  ;;  %v146_v9 = vld [vmem:[%s305_s2] ss:$0 sm:$0xff]  ;;  %s134_s1 = sshll.u32 %s230_s0, 4  ;;  %s135_s1 = int_to_ptr.vmem [resolvable:$true] %s134_s1 }
   0x5   :  { %167 = vmatprep.subr.bf16.mxu0 %v227_v3  ;;  %s179_s2 = scalar_lea.vmem %s135_s1, 128  ;;  %p184_p1 = scmp.lt.s32.totalorder %s135_s1, %s135_s1 }
   0x6   :  { %p180_p0 = scmp.ne.s32.totalorder %s135_s1, %s179_s2  ;;  %p185_p2 = scmp.lt.s32.totalorder %s179_s2, %s179_s2 }
   0x8   :  { %169 = vmatpush3.bf16.msra.mxu0 %v168_v7  ;;  %p186_p3 = por %p185_p2, %p184_p1 }
   0xa   :  { %p187_p4 = pnand %p186_p3, %p180_p0 }
   0xb   :  { %162 = vmatmul.mubr.msk.f32.vlgmr.msra.gmra.mrb[0].mxu0 %vm30_vm1, %v18_v8 }
  0xde   :  { %v100_v10 = vpop.f32.mrb[0].mxu0 }
  0xdf   :  { %v101_v11 = vadd.f32 %v146_v9, %v100_v10  ;;  %v163_v12 = vpop.f32.mrb[1].mxu0 }
  0xe1   :  { %v106_v13 = vsel %vm104_vm2, %v101_v11, -inf  ;;  %105 = vst.msk [vmem:[#allocation4] sm:$0xff] %vm104_vm2, %v101_v11 }
  0xe2   :  { %107 = vmax.xlane.f32.xlu0 %v106_v13 }
 0x16f   :  { %v108_v14 = vpop.xlane.xlu0 %107 }
 0x170   :  { %v109_v15 = vsub.f32 %v101_v11, %v108_v14 }
 0x172   :  { %v110_v16 = vmul.f32 1.442695, %v109_v15 }
 0x174   :  { %175 = vpow2.f32 %v110_v16 }
 0x17e   :  { %v176_v17 = vpop.eup %175 }
 0x17f   :  { %v112_v18 = vsel %vm104_vm2, %v176_v17, 0.0 }
 0x180   :  { %113 = vadd.xlane.f32.xlu0 %v112_v18 }
 0x181   :  { %190 = shalt.err (!%p187_p4)
}
 0x182   :  { %s191_s29 = scalar_lea.hbm %s307_s4, 128 }
 0x183   :  { %p192_p5 = scmp.ne.s32.totalorder %s307_s4, %s191_s29  ;;  %p195_p6 = scmp.lt.u32.totalorder %s191_s29, %s307_s4 }
 0x185   :  { %p197_p7 = pnand %p195_p6, %p192_p5 }
 0x187   :  { %200 = shalt.err (!%p197_p7)
}
 0x188   :  { %137 = dma.vmem_to_hbm [thread:$0]  %s135_s1, 128, %s307_s4, [#allocation5]  }
 0x189   :  { %s231_s10 = smov [#allocation2]  }
 0x18a   :  { %s124_s11 = sshll.u32 %s231_s10, 4  ;;  %s125_s11 = int_to_ptr.vmem [resolvable:$true] %s124_s11 }
 0x18b   :  { %s201_s12 = scalar_lea.vmem %s125_s11, 128  ;;  %p206_p9 = scmp.lt.s32.totalorder %s125_s11, %s125_s11 }
 0x18c   :  { %p202_p8 = scmp.ne.s32.totalorder %s125_s11, %s201_s12  ;;  %p207_p10 = scmp.lt.s32.totalorder %s201_s12, %s201_s12 }
 0x18e   :  { %p208_p11 = por %p207_p10, %p206_p9 }
 0x190   :  { %p209_p12 = pnand %p208_p11, %p202_p8 }
 0x20d   :  { %v114_v19 = vpop.xlane.xlu0 %113 }
 0x20e   :  { %177 = vrcp.f32 %v114_v19 }
 0x218   :  { %v178_v20 = vpop.eup %177 }
 0x219   :  { %v116_v21 = vmul.f32 %v178_v20, %v176_v17 }
 0x21b   :  { %117 = vst.msk [vmem:[#allocation2] sm:$0xff] %vm104_vm2, %v116_v21 }
 0x21c   :  { %212 = shalt.err (!%p209_p12)
}
 0x21d   :  { %s213_s4 = scalar_lea.hbm %s306_s3, 128 }
 0x21e   :  { %p214_p13 = scmp.ne.s32.totalorder %s306_s3, %s213_s4  ;;  %p217_p0 = scmp.lt.u32.totalorder %s213_s4, %s306_s3 }
 0x220   :  { %p219_p1 = pnand %p217_p0, %p214_p13 }
 0x222   :  { %222 = shalt.err (!%p219_p1)
}
 0x223   :  { %127 = dma.vmem_to_hbm [thread:$0]  %s125_s11, 128, %s306_s3, [#allocation3]  }
 0x224   :  { %223 = dma.done.wait [#allocation3], 128  }
 0x225   :  { %224 = vsyncadd [#allocation3], 4294967168 }
 0x226   :  { %225 = dma.done.wait [#allocation5], 128  }
 0x227   :  { %226 = vsyncadd [#allocation5], 4294967168 }
 0x228   :  { %144 = vsyncpa [#allocation3], 1 }
 0x229   :  { %145 = vsyncpa [#allocation5], 1 }

</bundles_post_ra>
